<compile_context>
chip_gen: v5e
topology: v5e:2x2
jax: 0.10.0
libtpu: 0.0.40
codegen_flags: <defaults>
</compile_context>

<pallas_src>
import functools

import jax
import jax.numpy as jnp
from jax.experimental import pallas as pl
from jax.experimental.pallas import tpu as pltpu

# Target per-block footprint (~2 MiB).  With x / out / pe each double-buffered
# this stays well inside the default scoped-VMEM limit on v5e/v6e/v7x.
_TARGET_BLOCK_BYTES = 2 * 1024 * 1024


def _pe_add_kernel(x_ref, pe_ref, o_ref):
    # x_ref / o_ref: (TB, TR, NC) tile covering TB batch elements.
    # pe_ref: (TR, NC) tile in x.dtype, resident across the innermost (batch)
    # grid axis, so it is DMA'd once per row tile.
    o_ref[...] = x_ref[...] + pe_ref[...][None, :, :]


@functools.lru_cache(maxsize=16)
def _make_pe(seq_len, d_model):
    """f32 (S, D) positional-encoding table, identical to the PyTorch buffer."""
    assert d_model % 2 == 0, "PositionalEncoding requires an even d_model"
    pos = jnp.arange(seq_len, dtype=jnp.float32)[:, None]
    div = 1.0 / (10000.0 ** (jnp.arange(0, d_model, 2, dtype=jnp.float32) / d_model))
    ang = pos * div  # (S, D//2)
    # Interleave sin (even cols) / cos (odd cols) with one stack+reshape
    # instead of two strided .at[...].set scatters.
    return jnp.stack([jnp.sin(ang), jnp.cos(ang)], axis=-1).reshape(seq_len, d_model)


def _row_tile(nr, nc, itemsize):
    """Full row extent if it fits the target block, else a fixed multiple-of-8
    row tile used with a cdiv grid (no divisibility requirement on nr)."""
    cap = max(8, (_TARGET_BLOCK_BYTES // (nc * itemsize)) // 8 * 8)
    return nr if nr <= cap else cap


def positional_encoding(x, dropout_p=0.1, training=False):
    """x: (B, S, D). Returns x + PE[:S]. Dropout is identity (eval mode)."""
    # nn.Dropout in eval mode is identity; p is ignored at inference.
    del dropout_p, training

    B, S, D = x.shape
    pe = _make_pe(S, D)  # cached; computed outside the kernel (plain JAX)

    # The add is purely elementwise between x[b, s, d] and pe[s, d], so any
    # consistent reshape of the trailing (S, D) axes of x and pe is equivalent.
    # Re-block so the last dim is lane-dense (128) whenever possible.
    L = S * D
    if L % 128 == 0:
        nc, nr = 128, L // 128
    else:
        # TODO(synk): D not a multiple of 128 -> masked partial stores; pad D
        # upstream for full lane-dense throughput.
        nc, nr = D, S

    itemsize = jnp.dtype(x.dtype).itemsize
    tr = _row_tile(nr, nc, itemsize)

    # Batch blocking: if one row tile covers the whole row axis and is small,
    # fold several batch elements into one grid step (~2 MiB per block).
    tb = 1
    block_bytes = tr * nc * itemsize
    if tr == nr and block_bytes < _TARGET_BLOCK_BYTES:
        tb = int(min(B, max(1, _TARGET_BLOCK_BYTES // block_bytes)))

    x3 = x.reshape(B, nr, nc)
    pe3 = pe.reshape(nr, nc).astype(x.dtype)

    grid = (pl.cdiv(nr, tr), pl.cdiv(B, tb))  # row outer, batch inner (PE resident)

    out3 = pl.pallas_call(
        _pe_add_kernel,
        out_shape=jax.ShapeDtypeStruct((B, nr, nc), x.dtype),
        grid_spec=pltpu.PrefetchScalarGridSpec(
            num_scalar_prefetch=0,
            grid=grid,
            in_specs=[
                pl.BlockSpec((tb, tr, nc), lambda r, b: (b, r, 0)),  # x tile
                pl.BlockSpec((tr, nc), lambda r, b: (r, 0)),         # pe tile
            ],
            out_specs=pl.BlockSpec((tb, tr, nc), lambda r, b: (b, r, 0)),
        ),
        compiler_params=pltpu.CompilerParams(
            dimension_semantics=("parallel", "parallel")),
        cost_estimate=pl.CostEstimate(
            flops=B * L,
            transcendentals=0,
            bytes_accessed=2 * B * L * itemsize + L * itemsize),
        input_output_aliases={0: 0},  # reuse x's HBM buffer when donated
    )(x3, pe3)
    return out3.reshape(B, S, D)


def _reference(x):
    B, S, D = x.shape
    return x + _make_pe(S, D)[None].astype(x.dtype)


if __name__ == "__main__":
    key = jax.random.PRNGKey(0)
    B, S, D = 2, 8, 32
    x = jax.random.normal(key, (B, S, D), dtype=jnp.float32)

    y_ref = _reference(x)  # computed before the (possibly aliasing) kernel call

    y = positional_encoding(x, dropout_p=0.1, training=False)
    y = jax.block_until_ready(y)

    assert y.shape == x.shape
    assert jnp.allclose(y, y_ref, atol=1e-5, rtol=1e-5), "mismatch vs reference"
    print("KERNEL_OK")
</pallas_src>

<mosaic_0001>
module attributes {stable_mosaic.version = 11 : i64} {
  func.func @_pe_add_kernel(%arg0: i32, %arg1: i32, %arg2: memref<2x2x128xf32, #tpu.memory_space<vmem>>, %arg3: memref<2x128xf32, #tpu.memory_space<vmem>>, %arg4: memref<2x2x128xf32, #tpu.memory_space<vmem>>) attributes {dimension_semantics = [#tpu.dimension_semantics<parallel>, #tpu.dimension_semantics<parallel>], iteration_bounds = array<i64: 1, 1>, scalar_prefetch = 0 : i64, scratch_operands = 0 : i64, tpu.core_type = #tpu.core_type<tc>, window_params = [{transform_indices = @transform_0, window_bounds = array<i64: 2, 2, 128>}, {transform_indices = @transform_1, window_bounds = array<i64: 2, 128>}, {transform_indices = @transform_2, window_bounds = array<i64: 2, 2, 128>}]} {
    %c0 = arith.constant 0 : index
    %c0_0 = arith.constant 0 : index
    %c0_1 = arith.constant 0 : index
    %0 = vector.load %arg2[%c0, %c0_0, %c0_1] : memref<2x2x128xf32, #tpu.memory_space<vmem>>, vector<2x2x128xf32>
    %c0_2 = arith.constant 0 : index
    %c0_3 = arith.constant 0 : index
    %1 = vector.load %arg3[%c0_2, %c0_3] : memref<2x128xf32, #tpu.memory_space<vmem>>, vector<2x128xf32>
    %2 = vector.shape_cast %1 : vector<2x128xf32> to vector<1x2x128xf32>
    %3 = vector.broadcast %2 : vector<1x2x128xf32> to vector<2x2x128xf32>
    %4 = arith.addf %0, %3 : vector<2x2x128xf32>
    %c0_4 = arith.constant 0 : index
    %c0_5 = arith.constant 0 : index
    %c0_6 = arith.constant 0 : index
    %5 = vector.load %arg4[%c0_4, %c0_5, %c0_6] : memref<2x2x128xf32, #tpu.memory_space<vmem>>, vector<2x2x128xf32>
    tpu.vector_store %arg4[%c0_4, %c0_5, %c0_6], %4 {strides = array<i32>} : memref<2x2x128xf32, #tpu.memory_space<vmem>>, vector<2x2x128xf32>,
    return
  }
  func.func @transform_0(%arg0: i32, %arg1: i32) -> (i32, i32, i32) {
    %c0_i32 = arith.constant 0 : i32
    %c0_i32_0 = arith.constant 0 : i32
    return %arg1, %arg0, %c0_i32 : i32, i32, i32
  }
  func.func @transform_1(%arg0: i32, %arg1: i32) -> (i32, i32) {
    %c0_i32 = arith.constant 0 : i32
    %c0_i32_0 = arith.constant 0 : i32
    return %arg0, %c0_i32 : i32, i32
  }
  func.func @transform_2(%arg0: i32, %arg1: i32) -> (i32, i32, i32) {
    %c0_i32 = arith.constant 0 : i32
    %c0_i32_0 = arith.constant 0 : i32
    return %arg1, %arg0, %c0_i32 : i32, i32, i32
  }
}

</mosaic_0001>

<bundles_post_ra>
// kernel: tpu_custom_call.1
= control target key start
LH: loop header
LB: loop body
LE: loop exit
PB: predicated region body
PF: predicated region fallthrough
CT: control target
= control target key end

     0   :  { %7 = vsyncpa [#allocation3], 0  ;;  %s138_s0 = inlined_call_operand.hbm [shape: f32[2,2,128], index: 0, kind: input, shape index: {}, may-alias: {0,2}]   ;;  %s139_s1 = inlined_call_operand.vmem [shape: f32[2,128], index: 1, kind: input, shape index: {}]   ;;  %s140_s2 = inlined_call_operand.hbm [shape: f32[2,2,128], index: 2, kind: output, shape index: {}, may-alias: {0,2}]  }
   0x1   :  { %8 = vsyncpa [#allocation4], 0  ;;  %s13_s11 = sshll.u32 %s138_s0, 4  ;;  %s110_s12 = smov [#allocation2]   ;;  %s14_s11 = int_to_ptr.hbm [resolvable:$true] %s13_s11 }
   0x2   :  { %s15_s13 = sshll.u32 %s110_s12, 4  ;;  %s111_s14 = smov 32   ;;  %s16_s13 = int_to_ptr.vmem [resolvable:$true] %s15_s13 }
   0x3   :  { %s112_s15 = smov 2  }
   0x4   :  { %21 = dma.hbm_to_vmem [thread:$0]  %s14_s11, 64, %s16_s13, [#allocation3], %s111_s14, %s111_s14, %s112_s15  }
   0x5   :  { %106 = dma.done.wait [#allocation3], 64  }
   0x6   :  { %107 = vsyncadd [#allocation3], 4294967232  ;;  %s113_s16 = smov [#allocation5]   ;;  %s41_s20 = sshll.u32 %s140_s2, 4  ;;  %v28_v0 = vld [vmem:[#allocation2] sm:$0x3]  ;;  %s42_s20 = int_to_ptr.hbm [resolvable:$true] %s41_s20 }
   0x7   :  { %s39_s17 = sshll.u32 %s113_s16, 4  ;;  %v30_v1 = vld [vmem:[%s139_s1] sm:$0x3]  ;;  %v29_v2 = vld [vmem:[#allocation2 + $0x2] sm:$0x3]  ;;  %s40_s17 = int_to_ptr.vmem [resolvable:$true] %s39_s17 }
   0x8   :  { %v31_v3 = vadd.f32 %v30_v1, %v28_v0  ;;  %v32_v4 = vadd.f32 %v30_v1, %v29_v2 }
   0xa   :  { %33 = vst [vmem:[#allocation5] sm:$0x3] %v31_v3 }
   0xb   :  { %34 = vst [vmem:[#allocation5 + $0x2] sm:$0x3] %v32_v4 }
   0xc   :  { %47 = dma.vmem_to_hbm [thread:$0]  %s40_s17, 64, %s42_s20, [#allocation4], %s111_s14, %s111_s14, %s112_s15  }
   0xd   :  { %108 = dma.done.wait [#allocation4], 64  }
   0xe   :  { %109 = vsyncadd [#allocation4], 4294967232 }
   0xf   :  { %52 = vsyncpa [#allocation3], 1 }
  0x10   :  { %53 = vsyncpa [#allocation4], 1 }

</bundles_post_ra>
